<compile_context>
chip_gen: v5e
topology: v5e:2x2
jax: 0.10.0
libtpu: 0.0.40
codegen_flags: <defaults>
</compile_context>

<pallas_src>
import functools

import jax
import jax.numpy as jnp
from jax import lax
from jax.experimental import pallas as pl
from jax.experimental.pallas import tpu as pltpu

_LANE = 128
_SUBLANE = 8


def _gat_kernel(src_ref, dst_ref, grp_ref,                 # scalar prefetch (SMEM), int32 [E]
                x_ref, w_ref, asrc_ref, adst_ref,          # VMEM inputs
                att_ref, wx_ref,                           # VMEM outputs
                ssrc_scr, sdst_scr, gmax_scr, gsum_scr,    # VMEM scratch [Np, Hp]
                *, n_edges, alpha):
    f32 = jnp.float32

    # ---- projection on the MXU: wx = x @ W  (Dp is a multiple of 128 -> lane-dense) ----
    wx = jnp.dot(x_ref[...], w_ref[...], preferred_element_type=f32)        # [Np, Dp]
    wx_ref[...] = wx.astype(wx_ref.dtype)

    # ---- node-level attention scores, hoisted before the per-edge gather ----
    #   s_src[n, h] = sum_k a[k]       * wx[n, h*d_k + k]
    #   s_dst[n, h] = sum_k a[d_k + k] * wx[n, h*d_k + k]
    # A_src / A_dst are block-diagonal [Dp, Hp] with Hp = 128 (lane-dense MXU output).
    ssrc_scr[...] = jnp.dot(wx, asrc_ref[...], preferred_element_type=f32)  # [Np, Hp]
    sdst_scr[...] = jnp.dot(wx, adst_ref[...], preferred_element_type=f32)  # [Np, Hp]

    # ---- init segment accumulators and the (padded) attention output ----
    gmax_scr[...] = jnp.full_like(gmax_scr, -1e30)
    gsum_scr[...] = jnp.zeros_like(gsum_scr)
    att_ref[...] = jnp.zeros_like(att_ref)

    neg_slope = f32(alpha)

    # ---- pass A: per-edge logits (SMEM-index gather) + segment max (scatter-max) ----
    # The logits are stashed in att_ref (reused as scratch) to save a VMEM buffer.
    def pass_a(e, carry):
        s = src_ref[e]
        d = dst_ref[e]
        g = grp_ref[e]
        logit = ssrc_scr[pl.ds(s, 1), :] + sdst_scr[pl.ds(d, 1), :]         # [1, Hp]
        logit = jnp.where(logit > 0, logit, neg_slope * logit)              # LeakyReLU
        att_ref[pl.ds(e, 1), :] = logit
        gmax_scr[pl.ds(g, 1), :] = jnp.maximum(gmax_scr[pl.ds(g, 1), :], logit)
        return carry

    lax.fori_loop(0, n_edges, pass_a, 0)

    # ---- pass B: exponentiate against the group max + segment sum (scatter-add) ----
    def pass_b(e, carry):
        g = grp_ref[e]
        ex = jnp.exp(att_ref[pl.ds(e, 1), :] - gmax_scr[pl.ds(g, 1), :])
        att_ref[pl.ds(e, 1), :] = ex
        gsum_scr[pl.ds(g, 1), :] = gsum_scr[pl.ds(g, 1), :] + ex
        return carry

    lax.fori_loop(0, n_edges, pass_b, 0)

    # ---- node-granularity reciprocal on the EUP, then pass C: normalize each edge ----
    gsum_scr[...] = pl.reciprocal(gsum_scr[...] + f32(1e-16), approx=True)

    def pass_c(e, carry):
        g = grp_ref[e]
        att_ref[pl.ds(e, 1), :] = att_ref[pl.ds(e, 1), :] * gsum_scr[pl.ds(g, 1), :]
        return carry

    lax.fori_loop(0, n_edges, pass_c, 0)


def _round_up(v, m):
    return ((v + m - 1) // m) * m


def sp_graph_attention_forward(x, edge, W, a, *, heads, d_k, alpha, norm_idx):
    """Returns (attention [E, heads], wx [N, heads*d_k]) — same as the PyTorch forward."""
    N, f_in = x.shape
    D = heads * d_k
    E = edge.shape[1]

    Np = _round_up(N, _SUBLANE)
    Ep = _round_up(E, _SUBLANE)
    Dp = _round_up(D, _LANE)          # lane-dense wx output
    Hp = _LANE                        # lane-dense attention output (heads padded to 128)
    assert heads <= Hp

    # --- glue: zero-padded, lane-dense operands ---
    x_p = jnp.zeros((Np, f_in), jnp.float32).at[:N, :].set(x.astype(jnp.float32))
    W_p = jnp.zeros((f_in, Dp), jnp.float32).at[:, :D].set(W.astype(jnp.float32))

    # block-diagonal per-head reduction matrices:
    #   A_src[h*d_k + k, h] = a[k]      A_dst[h*d_k + k, h] = a[d_k + k]
    a_flat = a.reshape(2 * d_k).astype(jnp.float32)
    eye_h = jnp.eye(heads, dtype=jnp.float32)
    A_src = jnp.kron(eye_h, a_flat[:d_k][:, None])      # [D, heads]
    A_dst = jnp.kron(eye_h, a_flat[d_k:][:, None])      # [D, heads]
    A_src_p = jnp.zeros((Dp, Hp), jnp.float32).at[:D, :heads].set(A_src)
    A_dst_p = jnp.zeros((Dp, Hp), jnp.float32).at[:D, :heads].set(A_dst)

    src = edge[0].astype(jnp.int32)
    dst = edge[1].astype(jnp.int32)
    grp = edge[norm_idx].astype(jnp.int32)

    kernel = functools.partial(_gat_kernel, n_edges=E, alpha=float(alpha))
    att_p, wx_p = pl.pallas_call(
        kernel,
        out_shape=(jax.ShapeDtypeStruct((Ep, Hp), jnp.float32),
                   jax.ShapeDtypeStruct((Np, Dp), jnp.float32)),
        grid_spec=pltpu.PrefetchScalarGridSpec(
            num_scalar_prefetch=3,                       # src, dst, group indices -> SMEM
            grid=(1,),
            in_specs=[
                pl.BlockSpec((Np, f_in), lambda i, *_: (0, 0)),
                pl.BlockSpec((f_in, Dp), lambda i, *_: (0, 0)),
                pl.BlockSpec((Dp, Hp), lambda i, *_: (0, 0)),
                pl.BlockSpec((Dp, Hp), lambda i, *_: (0, 0)),
            ],
            out_specs=[
                pl.BlockSpec((Ep, Hp), lambda i, *_: (0, 0)),
                pl.BlockSpec((Np, Dp), lambda i, *_: (0, 0)),
            ],
            scratch_shapes=[
                pltpu.VMEM((Np, Hp), jnp.float32),       # s_src  (node-level scores)
                pltpu.VMEM((Np, Hp), jnp.float32),       # s_dst
                pltpu.VMEM((Np, Hp), jnp.float32),       # segment max
                pltpu.VMEM((Np, Hp), jnp.float32),       # segment sum -> reciprocal
            ]),
        compiler_params=pltpu.CompilerParams(
            dimension_semantics=("arbitrary",)),
    )(src, dst, grp, x_p, W_p, A_src_p, A_dst_p)

    return att_p[:E, :heads], wx_p[:N, :D]


def reference_forward(x, edge, W, a, *, heads, d_k, alpha, norm_idx):
    """Pure-JAX replica of the PyTorch forward for validation."""
    N = x.shape[0]
    wx = jnp.dot(x, W)
    h = wx.reshape(-1, heads, d_k).transpose(0, 2, 1)           # [N, d_k, H]
    edge_h = jnp.concatenate([h[edge[0]], h[edge[1]]], axis=1)  # [E, 2*d_k, H]
    edge_h = edge_h.transpose(1, 0, 2)                          # [2*d_k, E, H]
    e = jnp.sum(a * edge_h, axis=0)                             # [E, H]
    e = jnp.where(e > 0, e, alpha * e)                          # LeakyReLU
    idx = edge[norm_idx]
    gmax = jax.ops.segment_max(e, idx, num_segments=N)
    ex = jnp.exp(e - gmax[idx])
    gsum = jax.ops.segment_sum(ex, idx, num_segments=N)
    att = ex / (gsum[idx] + 1e-16)
    return att, wx


if __name__ == "__main__":
    # small shapes consistent with the module
    N, F_IN = 16, 32                 # nodes, in_features
    HEADS, ATTN_DIM = 4, 32          # opt['heads'], opt['attention_dim']
    D_K = ATTN_DIM // HEADS
    ALPHA = 0.2                      # opt['leaky_relu_slope']
    NORM_IDX = 0                     # opt['attention_norm_idx']
    E = 32                           # number of edges

    key = jax.random.PRNGKey(0)
    k_x, k_e, k_w, k_a = jax.random.split(key, 4)

    x = jax.random.normal(k_x, (N, F_IN), jnp.float32)
    edge = jax.random.randint(k_e, (2, E), 0, N, dtype=jnp.int32)

    # deterministic xavier_normal_-style init (gain=1.414), as in __init__
    gain = 1.414
    std_W = gain * (2.0 / (F_IN + ATTN_DIM)) ** 0.5
    W = std_W * jax.random.normal(k_w, (F_IN, ATTN_DIM), jnp.float32)
    std_a = gain * (2.0 / (1 + 2 * D_K)) ** 0.5
    a = std_a * jax.random.normal(k_a, (2 * D_K, 1, 1), jnp.float32)
    # NOTE: self.Wout is initialized in __init__ but never used in forward().

    att, wx = sp_graph_attention_forward(
        x, edge, W, a, heads=HEADS, d_k=D_K, alpha=ALPHA, norm_idx=NORM_IDX)
    jax.block_until_ready((att, wx))

    att_ref, wx_ref = reference_forward(
        x, edge, W, a, heads=HEADS, d_k=D_K, alpha=ALPHA, norm_idx=NORM_IDX)

    assert att.shape == (E, HEADS) and wx.shape == (N, ATTN_DIM)
    assert jnp.allclose(wx, wx_ref, rtol=1e-2, atol=1e-3)
    assert jnp.allclose(att, att_ref, rtol=1e-2, atol=1e-3)
    print("KERNEL_OK")
</pallas_src>

<mosaic_0001>
module attributes {stable_mosaic.version = 11 : i64} {
  func.func @_gat_kernel(%arg0: i32, %arg1: memref<32xi32, #tpu.memory_space<smem>>, %arg2: memref<32xi32, #tpu.memory_space<smem>>, %arg3: memref<32xi32, #tpu.memory_space<smem>>, %arg4: memref<16x32xf32, #tpu.memory_space<vmem>>, %arg5: memref<32x128xf32, #tpu.memory_space<vmem>>, %arg6: memref<128x128xf32, #tpu.memory_space<vmem>>, %arg7: memref<128x128xf32, #tpu.memory_space<vmem>>, %arg8: memref<32x128xf32, #tpu.memory_space<vmem>>, %arg9: memref<16x128xf32, #tpu.memory_space<vmem>>, %arg10: memref<16x128xf32, #tpu.memory_space<vmem>>, %arg11: memref<16x128xf32, #tpu.memory_space<vmem>>, %arg12: memref<16x128xf32, #tpu.memory_space<vmem>>, %arg13: memref<16x128xf32, #tpu.memory_space<vmem>>) attributes {dimension_semantics = [#tpu.dimension_semantics<arbitrary>], iteration_bounds = array<i64: 1>, scalar_prefetch = 3 : i64, scratch_operands = 4 : i64, tpu.core_type = #tpu.core_type<tc>, window_params = [{pipeline_mode = #tpu.pipeline_mode<synchronous>, transform_indices = @transform_0, window_bounds = array<i64: 16, 32>}, {pipeline_mode = #tpu.pipeline_mode<synchronous>, transform_indices = @transform_1, window_bounds = array<i64: 32, 128>}, {pipeline_mode = #tpu.pipeline_mode<synchronous>, transform_indices = @transform_2, window_bounds = array<i64: 128, 128>}, {pipeline_mode = #tpu.pipeline_mode<synchronous>, transform_indices = @transform_3, window_bounds = array<i64: 128, 128>}, {pipeline_mode = #tpu.pipeline_mode<synchronous>, transform_indices = @transform_4, window_bounds = array<i64: 32, 128>}, {pipeline_mode = #tpu.pipeline_mode<synchronous>, transform_indices = @transform_5, window_bounds = array<i64: 16, 128>}]} {
    %c0 = arith.constant 0 : index
    %c0_0 = arith.constant 0 : index
    %0 = vector.load %arg4[%c0, %c0_0] : memref<16x32xf32, #tpu.memory_space<vmem>>, vector<16x32xf32>
    %c0_1 = arith.constant 0 : index
    %c0_2 = arith.constant 0 : index
    %1 = vector.load %arg5[%c0_1, %c0_2] : memref<32x128xf32, #tpu.memory_space<vmem>>, vector<32x128xf32>
    %cst = arith.constant dense<0.000000e+00> : vector<16x128xf32>
    %2 = tpu.matmul %0, %1, %cst {dimension_numbers = #tpu.dot_dimension_numbers<[1], [0], [0], [1], [0, 0, 1, 1], [], []>} : vector<16x32xf32>, vector<32x128xf32>, vector<16x128xf32> -> vector<16x128xf32>
    %c0_3 = arith.constant 0 : index
    %c0_4 = arith.constant 0 : index
    %3 = vector.load %arg9[%c0_3, %c0_4] : memref<16x128xf32, #tpu.memory_space<vmem>>, vector<16x128xf32>
    tpu.vector_store %arg9[%c0_3, %c0_4], %2 {strides = array<i32>} : memref<16x128xf32, #tpu.memory_space<vmem>>, vector<16x128xf32>,
    %c0_5 = arith.constant 0 : index
    %c0_6 = arith.constant 0 : index
    %4 = vector.load %arg6[%c0_5, %c0_6] : memref<128x128xf32, #tpu.memory_space<vmem>>, vector<128x128xf32>
    %cst_7 = arith.constant dense<0.000000e+00> : vector<16x128xf32>
    %5 = tpu.matmul %2, %4, %cst_7 {dimension_numbers = #tpu.dot_dimension_numbers<[1], [0], [0], [1], [0, 0, 1, 1], [], []>} : vector<16x128xf32>, vector<128x128xf32>, vector<16x128xf32> -> vector<16x128xf32>
    %c0_8 = arith.constant 0 : index
    %c0_9 = arith.constant 0 : index
    %6 = vector.load %arg10[%c0_8, %c0_9] : memref<16x128xf32, #tpu.memory_space<vmem>>, vector<16x128xf32>
    tpu.vector_store %arg10[%c0_8, %c0_9], %5 {strides = array<i32>} : memref<16x128xf32, #tpu.memory_space<vmem>>, vector<16x128xf32>,
    %c0_10 = arith.constant 0 : index
    %c0_11 = arith.constant 0 : index
    %7 = vector.load %arg7[%c0_10, %c0_11] : memref<128x128xf32, #tpu.memory_space<vmem>>, vector<128x128xf32>
    %cst_12 = arith.constant dense<0.000000e+00> : vector<16x128xf32>
    %8 = tpu.matmul %2, %7, %cst_12 {dimension_numbers = #tpu.dot_dimension_numbers<[1], [0], [0], [1], [0, 0, 1, 1], [], []>} : vector<16x128xf32>, vector<128x128xf32>, vector<16x128xf32> -> vector<16x128xf32>
    %c0_13 = arith.constant 0 : index
    %c0_14 = arith.constant 0 : index
    %9 = vector.load %arg11[%c0_13, %c0_14] : memref<16x128xf32, #tpu.memory_space<vmem>>, vector<16x128xf32>
    tpu.vector_store %arg11[%c0_13, %c0_14], %8 {strides = array<i32>} : memref<16x128xf32, #tpu.memory_space<vmem>>, vector<16x128xf32>,
    %cst_15 = arith.constant -1.000000e+30 : f32
    %10 = vector.broadcast %cst_15 : f32 to vector<16x128xf32>
    %c0_16 = arith.constant 0 : index
    %c0_17 = arith.constant 0 : index
    %11 = vector.load %arg12[%c0_16, %c0_17] : memref<16x128xf32, #tpu.memory_space<vmem>>, vector<16x128xf32>
    tpu.vector_store %arg12[%c0_16, %c0_17], %10 {strides = array<i32>} : memref<16x128xf32, #tpu.memory_space<vmem>>, vector<16x128xf32>,
    %cst_18 = arith.constant 0.000000e+00 : f32
    %12 = vector.broadcast %cst_18 : f32 to vector<16x128xf32>
    %c0_19 = arith.constant 0 : index
    %c0_20 = arith.constant 0 : index
    %13 = vector.load %arg13[%c0_19, %c0_20] : memref<16x128xf32, #tpu.memory_space<vmem>>, vector<16x128xf32>
    tpu.vector_store %arg13[%c0_19, %c0_20], %12 {strides = array<i32>} : memref<16x128xf32, #tpu.memory_space<vmem>>, vector<16x128xf32>,
    %cst_21 = arith.constant 0.000000e+00 : f32
    %14 = vector.broadcast %cst_21 : f32 to vector<32x128xf32>
    %c0_22 = arith.constant 0 : index
    %c0_23 = arith.constant 0 : index
    %15 = vector.load %arg8[%c0_22, %c0_23] : memref<32x128xf32, #tpu.memory_space<vmem>>, vector<32x128xf32>
    tpu.vector_store %arg8[%c0_22, %c0_23], %14 {strides = array<i32>} : memref<32x128xf32, #tpu.memory_space<vmem>>, vector<32x128xf32>,
    %cst_24 = arith.constant 2.000000e-01 : f32
    %c0_i32 = arith.constant 0 : i32
    %c32_i32 = arith.constant 32 : i32
    %16 = arith.addi %c0_i32, %c32_i32 : i32
    %c1_i32 = arith.constant 1 : i32
    scf.for %arg14 = %c0_i32 to %16 step %c1_i32  : i32 {
      %24 = arith.index_cast %arg14 : i32 to index
      %25 = memref.load %arg1[%24] : memref<32xi32, #tpu.memory_space<smem>>
      %26 = arith.index_cast %arg14 : i32 to index
      %27 = memref.load %arg2[%26] : memref<32xi32, #tpu.memory_space<smem>>
      %28 = arith.index_cast %arg14 : i32 to index
      %29 = memref.load %arg3[%28] : memref<32xi32, #tpu.memory_space<smem>>
      %30 = arith.index_cast %25 : i32 to index
      %c0_39 = arith.constant 0 : index
      %31 = vector.load %arg10[%30, %c0_39] : memref<16x128xf32, #tpu.memory_space<vmem>>, vector<1x128xf32>
      %32 = arith.index_cast %27 : i32 to index
      %c0_40 = arith.constant 0 : index
      %33 = vector.load %arg11[%32, %c0_40] : memref<16x128xf32, #tpu.memory_space<vmem>>, vector<1x128xf32>
      %34 = arith.addf %31, %33 : vector<1x128xf32>
      %cst_41 = arith.constant 0.000000e+00 : f32
      %35 = vector.broadcast %cst_41 : f32 to vector<1x128xf32>
      %36 = arith.cmpf ogt, %34, %35 : vector<1x128xf32>
      %37 = vector.broadcast %cst_24 : f32 to vector<1x128xf32>
      %38 = arith.mulf %37, %34 : vector<1x128xf32>
      %39 = arith.select %36, %34, %38 : vector<1x128xi1>, vector<1x128xf32>
      %40 = arith.index_cast %arg14 : i32 to index
      %c0_42 = arith.constant 0 : index
      %41 = vector.load %arg8[%40, %c0_42] : memref<32x128xf32, #tpu.memory_space<vmem>>, vector<1x128xf32>
      tpu.vector_store %arg8[%40, %c0_42], %39 {strides = array<i32>} : memref<32x128xf32, #tpu.memory_space<vmem>>, vector<1x128xf32>,
      %42 = arith.index_cast %29 : i32 to index
      %c0_43 = arith.constant 0 : index
      %43 = vector.load %arg12[%42, %c0_43] : memref<16x128xf32, #tpu.memory_space<vmem>>, vector<1x128xf32>
      %44 = arith.maximumf %43, %39 : vector<1x128xf32>
      %45 = arith.index_cast %29 : i32 to index
      %c0_44 = arith.constant 0 : index
      %46 = vector.load %arg12[%45, %c0_44] : memref<16x128xf32, #tpu.memory_space<vmem>>, vector<1x128xf32>
      tpu.vector_store %arg12[%45, %c0_44], %44 {strides = array<i32>} : memref<16x128xf32, #tpu.memory_space<vmem>>, vector<1x128xf32>,
    }
    %c32_i32_25 = arith.constant 32 : i32
    %c0_i32_26 = arith.constant 0 : i32
    %c32_i32_27 = arith.constant 32 : i32
    %17 = arith.addi %c0_i32_26, %c32_i32_27 : i32
    %c1_i32_28 = arith.constant 1 : i32
    scf.for %arg14 = %c0_i32_26 to %17 step %c1_i32_28  : i32 {
      %24 = arith.index_cast %arg14 : i32 to index
      %25 = memref.load %arg3[%24] : memref<32xi32, #tpu.memory_space<smem>>
      %26 = arith.index_cast %arg14 : i32 to index
      %c0_39 = arith.constant 0 : index
      %27 = vector.load %arg8[%26, %c0_39] : memref<32x128xf32, #tpu.memory_space<vmem>>, vector<1x128xf32>
      %28 = arith.index_cast %25 : i32 to index
      %c0_40 = arith.constant 0 : index
      %29 = vector.load %arg12[%28, %c0_40] : memref<16x128xf32, #tpu.memory_space<vmem>>, vector<1x128xf32>
      %30 = arith.subf %27, %29 : vector<1x128xf32>
      %31 = math.exp %30 : vector<1x128xf32>
      %32 = arith.index_cast %arg14 : i32 to index
      %c0_41 = arith.constant 0 : index
      %33 = vector.load %arg8[%32, %c0_41] : memref<32x128xf32, #tpu.memory_space<vmem>>, vector<1x128xf32>
      tpu.vector_store %arg8[%32, %c0_41], %31 {strides = array<i32>} : memref<32x128xf32, #tpu.memory_space<vmem>>, vector<1x128xf32>,
      %34 = arith.index_cast %25 : i32 to index
      %c0_42 = arith.constant 0 : index
      %35 = vector.load %arg13[%34, %c0_42] : memref<16x128xf32, #tpu.memory_space<vmem>>, vector<1x128xf32>
      %36 = arith.addf %35, %31 : vector<1x128xf32>
      %37 = arith.index_cast %25 : i32 to index
      %c0_43 = arith.constant 0 : index
      %38 = vector.load %arg13[%37, %c0_43] : memref<16x128xf32, #tpu.memory_space<vmem>>, vector<1x128xf32>
      tpu.vector_store %arg13[%37, %c0_43], %36 {strides = array<i32>} : memref<16x128xf32, #tpu.memory_space<vmem>>, vector<1x128xf32>,
    }
    %c32_i32_29 = arith.constant 32 : i32
    %c0_30 = arith.constant 0 : index
    %c0_31 = arith.constant 0 : index
    %18 = vector.load %arg13[%c0_30, %c0_31] : memref<16x128xf32, #tpu.memory_space<vmem>>, vector<16x128xf32>
    %cst_32 = arith.constant 1.000000e-16 : f32
    %19 = vector.broadcast %cst_32 : f32 to vector<16x128xf32>
    %20 = arith.addf %18, %19 : vector<16x128xf32>
    %21 = tpu.reciprocal %20 {approx = true} : vector<16x128xf32> -> vector<16x128xf32>
    %c0_33 = arith.constant 0 : index
    %c0_34 = arith.constant 0 : index
    %22 = vector.load %arg13[%c0_33, %c0_34] : memref<16x128xf32, #tpu.memory_space<vmem>>, vector<16x128xf32>
    tpu.vector_store %arg13[%c0_33, %c0_34], %21 {strides = array<i32>} : memref<16x128xf32, #tpu.memory_space<vmem>>, vector<16x128xf32>,
    %c0_i32_35 = arith.constant 0 : i32
    %c32_i32_36 = arith.constant 32 : i32
    %23 = arith.addi %c0_i32_35, %c32_i32_36 : i32
    %c1_i32_37 = arith.constant 1 : i32
    scf.for %arg14 = %c0_i32_35 to %23 step %c1_i32_37  : i32 {
      %24 = arith.index_cast %arg14 : i32 to index
      %25 = memref.load %arg3[%24] : memref<32xi32, #tpu.memory_space<smem>>
      %26 = arith.index_cast %arg14 : i32 to index
      %c0_39 = arith.constant 0 : index
      %27 = vector.load %arg8[%26, %c0_39] : memref<32x128xf32, #tpu.memory_space<vmem>>, vector<1x128xf32>
      %28 = arith.index_cast %25 : i32 to index
      %c0_40 = arith.constant 0 : index
      %29 = vector.load %arg13[%28, %c0_40] : memref<16x128xf32, #tpu.memory_space<vmem>>, vector<1x128xf32>
      %30 = arith.mulf %27, %29 : vector<1x128xf32>
      %31 = arith.index_cast %arg14 : i32 to index
      %c0_41 = arith.constant 0 : index
      %32 = vector.load %arg8[%31, %c0_41] : memref<32x128xf32, #tpu.memory_space<vmem>>, vector<1x128xf32>
      tpu.vector_store %arg8[%31, %c0_41], %30 {strides = array<i32>} : memref<32x128xf32, #tpu.memory_space<vmem>>, vector<1x128xf32>,
    }
    %c32_i32_38 = arith.constant 32 : i32
    return
  }
  func.func @transform_0(%arg0: i32, %arg1: memref<32xi32, #tpu.memory_space<smem>>, %arg2: memref<32xi32, #tpu.memory_space<smem>>, %arg3: memref<32xi32, #tpu.memory_space<smem>>) -> (i32, i32) {
    %c0_i32 = arith.constant 0 : i32
    %c0_i32_0 = arith.constant 0 : i32
    %c0_i32_1 = arith.constant 0 : i32
    return %c0_i32, %c0_i32_0 : i32, i32
  }
  func.func @transform_1(%arg0: i32, %arg1: memref<32xi32, #tpu.memory_space<smem>>, %arg2: memref<32xi32, #tpu.memory_space<smem>>, %arg3: memref<32xi32, #tpu.memory_space<smem>>) -> (i32, i32) {
    %c0_i32 = arith.constant 0 : i32
    %c0_i32_0 = arith.constant 0 : i32
    %c0_i32_1 = arith.constant 0 : i32
    return %c0_i32, %c0_i32_0 : i32, i32
  }
  func.func @transform_2(%arg0: i32, %arg1: memref<32xi32, #tpu.memory_space<smem>>, %arg2: memref<32xi32, #tpu.memory_space<smem>>, %arg3: memref<32xi32, #tpu.memory_space<smem>>) -> (i32, i32) {
    %c0_i32 = arith.constant 0 : i32
    %c0_i32_0 = arith.constant 0 : i32
    %c0_i32_1 = arith.constant 0 : i32
    return %c0_i32, %c0_i32_0 : i32, i32
  }
  func.func @transform_3(%arg0: i32, %arg1: memref<32xi32, #tpu.memory_space<smem>>, %arg2: memref<32xi32, #tpu.memory_space<smem>>, %arg3: memref<32xi32, #tpu.memory_space<smem>>) -> (i32, i32) {
    %c0_i32 = arith.constant 0 : i32
    %c0_i32_0 = arith.constant 0 : i32
    %c0_i32_1 = arith.constant 0 : i32
    return %c0_i32, %c0_i32_0 : i32, i32
  }
  func.func @transform_4(%arg0: i32, %arg1: memref<32xi32, #tpu.memory_space<smem>>, %arg2: memref<32xi32, #tpu.memory_space<smem>>, %arg3: memref<32xi32, #tpu.memory_space<smem>>) -> (i32, i32) {
    %c0_i32 = arith.constant 0 : i32
    %c0_i32_0 = arith.constant 0 : i32
    %c0_i32_1 = arith.constant 0 : i32
    return %c0_i32, %c0_i32_0 : i32, i32
  }
  func.func @transform_5(%arg0: i32, %arg1: memref<32xi32, #tpu.memory_space<smem>>, %arg2: memref<32xi32, #tpu.memory_space<smem>>, %arg3: memref<32xi32, #tpu.memory_space<smem>>) -> (i32, i32) {
    %c0_i32 = arith.constant 0 : i32
    %c0_i32_0 = arith.constant 0 : i32
    %c0_i32_1 = arith.constant 0 : i32
    return %c0_i32, %c0_i32_0 : i32, i32
  }
}

</mosaic_0001>

<bundles_post_ra>
// kernel: tpu_custom_call.1
= control target key start
LH: loop header
LB: loop body
LE: loop exit
PB: predicated region body
PF: predicated region fallthrough
CT: control target
= control target key end

     0   :  { %s636_s11 = smov [#allocation7]   ;;  %s637_s12 = smov [#allocation8]   ;;  %s741_s0 = inlined_call_operand.hbm [shape: s32[32], index: 0, kind: input, shape index: {}]   ;;  %s742_s3 = inlined_call_operand.hbm [shape: f32[16,32], index: 3, kind: input, shape index: {}]   ;;  %s743_s4 = inlined_call_operand.hbm [shape: f32[32,128], index: 4, kind: input, shape index: {}]   ;;  %s744_s5 = inlined_call_operand.hbm [shape: f32[128,128], index: 5, kind: input, shape index: {}]   ;;  %s745_s6 = inlined_call_operand.hbm [shape: f32[128,128], index: 6, kind: input, shape index: {}]   ;;  %s746_s7 = inlined_call_operand.hbm [shape: f32[32,128], index: 7, kind: output, shape index: {0}]   ;;  %s747_s8 = inlined_call_operand.hbm [shape: f32[16,128], index: 8, kind: output, shape index: {1}]   ;;  %s748_s1 = inlined_call_operand.hbm [shape: s32[32], index: 1, kind: input, shape index: {}]   ;;  %s749_s2 = inlined_call_operand.vmem [shape: s32[32], index: 2, kind: input, shape index: {}]  }
   0x1   :  { %s15_s29 = sshll.u32 %s741_s0, 4  ;;  %s20_s10 = sshll.u32 %s748_s1, 4  ;;  %s16_s29 = int_to_ptr.hbm [resolvable:$true] %s15_s29  ;;  %s21_s10 = int_to_ptr.hbm [resolvable:$true] %s20_s10 }
   0x2   :  { %18 = dma.hbm_to_smem %s16_s29, 16, %s636_s11, [#allocation6] }
   0x3   :  { %23 = dma.hbm_to_smem %s21_s10, 16, %s637_s12, [#allocation6] }
   0x4   :  { %s25_s15 = sshll.u32 %s749_s2, 4  ;;  %s638_s16 = smov [#allocation9]   ;;  %s26_s15 = int_to_ptr.vmem [resolvable:$true] %s25_s15 }
   0x5   :  { %28 = dma.vmem_to_smem %s26_s15, 16, %s638_s16, [#allocation6] }
   0x6   :  { %612 = dma.done.wait [#allocation6], 48 }
   0x7   :  { %613 = vsyncadd [#allocation6], 4294967248 }
   0x8   :  { %31 = sfence }
   0x9   :  { %32 = vsyncpa [#allocation11], 0 }
   0xa   :  { %33 = vsyncpa [#allocation14], 0 }
   0xb   :  { %34 = vsyncpa [#allocation17], 0 }
   0xc   :  { %35 = vsyncpa [#allocation12], 0 }
   0xd   :  { %36 = vsyncpa [#allocation20], 0  ;;  %s54_s17 = sshll.u32 %s743_s4, 4  ;;  %s639_s18 = smov [#allocation13]   ;;  %s55_s17 = int_to_ptr.hbm [resolvable:$true] %s54_s17 }
   0xe   :  { %s56_s19 = sshll.u32 %s639_s18, 4  ;;  %s41_s21 = sshll.u32 %s742_s3, 4  ;;  %s57_s19 = int_to_ptr.vmem [resolvable:$true] %s56_s19  ;;  %s42_s21 = int_to_ptr.hbm [resolvable:$true] %s41_s21 }
   0xf   :  { %s640_s22 = smov 128   ;;  %s641_s23 = smov 8  }
  0x10   :  { %62 = dma.hbm_to_vmem [thread:$0]  %s55_s17, 512, %s57_s19, [#allocation14], %s640_s22, %s640_s22, %s641_s23  }
  0x11   :  { %s642_s24 = smov [#allocation10]   ;;  %s67_s4 = sshll.u32 %s744_s5, 4  ;;  %s68_s4 = int_to_ptr.hbm [resolvable:$true] %s67_s4 }
  0x12   :  { %s43_s25 = sshll.u32 %s642_s24, 4  ;;  %s80_s29 = sshll.u32 %s745_s6, 4  ;;  %s44_s25 = int_to_ptr.vmem [resolvable:$true] %s43_s25  ;;  %s81_s29 = int_to_ptr.hbm [resolvable:$true] %s80_s29 }
  0x13   :  { %49 = dma.hbm_to_vmem [thread:$0]  %s42_s21, 256, %s44_s25, [#allocation11], %s640_s22, %s640_s22, %s641_s23  }
  0x14   :  { %s643_s30 = smov [#allocation15]   ;;  %s644_s10 = smov [#allocation16]  }
  0x15   :  { %s69_s9 = sshll.u32 %s643_s30, 4  ;;  %s82_s5 = sshll.u32 %s644_s10, 4  ;;  %s70_s9 = int_to_ptr.vmem [resolvable:$true] %s69_s9  ;;  %s83_s5 = int_to_ptr.vmem [resolvable:$true] %s82_s5 }
  0x16   :  { %75 = dma.hbm_to_vmem [thread:$0]  %s68_s4, 2048, %s70_s9, [#allocation14], %s640_s22, %s640_s22, %s641_s23  }
  0x17   :  { %88 = dma.hbm_to_vmem [thread:$0]  %s81_s29, 2048, %s83_s5, [#allocation17], %s640_s22, %s640_s22, %s641_s23  }
  0x18   :  { %614 = dma.done.wait [#allocation11], 256  }
  0x19   :  { %615 = vsyncadd [#allocation11], 4294967040 }
  0x1a   :  { %616 = dma.done.wait [#allocation14], 2560  }
  0x1b   :  { %617 = vsyncadd [#allocation14], 4294964736 }
  0x1c   :  { %618 = dma.done.wait [#allocation17], 2048  }
  0x1d   :  { %619 = vsyncadd [#allocation17], 4294965248  ;;  %v645_v0 = vmov -1e+30   ;;  %v646_v1 = vmov 0.0   ;;  %v110_v2 = vld [vmem:[#allocation13 + $0x18] sm:$0xff] }
  0x1e   :  { %225 = vst [vmem:[#allocation4] sm:$0xff] %v645_v0  ;;  %v109_v3 = vld [vmem:[#allocation13 + $0x10] sm:$0xff]  ;;  %130 = vmatpush.msra.mxu0 %v110_v2  ;;  %v108_v4 = vld [vmem:[#allocation13 + $0x8] sm:$0xff]  ;;  %v158_v5 = vld [vmem:[#allocation15 + $0x78] sm:$0xff]  ;;  %vm111_vm0 = vcmask 261120   ;;  %s624_s6 = smov 0  }
  0x1f   :  { %226 = vst [vmem:[#allocation4 + $0x8] sm:$0xff] %v645_v0  ;;  %v199_v6 = vld [vmem:[#allocation16 + $0x78] sm:$0xff]  ;;  %v157_v7 = vld [vmem:[#allocation15 + $0x70] sm:$0xff]  ;;  %159 = vmatpush.msra.mxu1 %v158_v5  ;;  %v107_v9 = vld [vmem:[#allocation13] sm:$0xff]  ;;  %361 = vmatpush.msra.mxu3 %v158_v5 }
  0x20   :  { %227 = vst [vmem:[#allocation5] sm:$0xff] %v646_v1  ;;  %131 = vmatpush.msra.mxu0 %v109_v3  ;;  %v198_v8 = vld [vmem:[#allocation16 + $0x70] sm:$0xff]  ;;  %200 = vmatpush.msra.mxu2 %v199_v6  ;;  %v156_v10 = vld [vmem:[#allocation15 + $0x68] sm:$0xff]  ;;  %v155_v13 = vld [vmem:[#allocation15 + $0x60] sm:$0xff] }
  0x21   :  { %228 = vst [vmem:[#allocation5 + $0x8] sm:$0xff] %v646_v1  ;;  %v105_v11 = vld [vmem:[#allocation10] sm:$0xff]  ;;  %160 = vmatpush.msra.mxu1 %v157_v7  ;;  %v197_v12 = vld [vmem:[#allocation16 + $0x68] sm:$0xff]  ;;  %362 = vmatpush.msra.mxu3 %v157_v7  ;;  %v196_v14 = vld [vmem:[#allocation16 + $0x60] sm:$0xff] }
  0x22   :  { %229 = vst [vmem:[#allocation18] sm:$0xff] %v646_v1  ;;  %132 = vmatpush.msra.mxu0 %v108_v4  ;;  %201 = vmatpush.msra.mxu2 %v198_v8  ;;  %v154_v15 = vld [vmem:[#allocation15 + $0x58] sm:$0xff]  ;;  %v153_v17 = vld [vmem:[#allocation15 + $0x50] sm:$0xff]  ;;  %v152_v19 = vld [vmem:[#allocation15 + $0x48] sm:$0xff] }
  0x23   :  { %230 = vst [vmem:[#allocation18 + $0x8] sm:$0xff] %v646_v1  ;;  %161 = vmatpush.msra.mxu1 %v156_v10  ;;  %v195_v16 = vld [vmem:[#allocation16 + $0x58] sm:$0xff]  ;;  %363 = vmatpush.msra.mxu3 %v156_v10  ;;  %v194_v18 = vld [vmem:[#allocation16 + $0x50] sm:$0xff]  ;;  %v193_v21 = vld [vmem:[#allocation16 + $0x48] sm:$0xff] }
  0x24   :  { %231 = vst [vmem:[#allocation18 + $0x10] sm:$0xff] %v646_v1  ;;  %133 = vmatpush.msra.mxu0 %v107_v9  ;;  %202 = vmatpush.msra.mxu2 %v197_v12  ;;  %v106_v20 = vld [vmem:[#allocation10 + $0x8] sm:$0xff]  ;;  %v151_v22 = vld [vmem:[#allocation15 + $0x40] sm:$0xff]  ;;  %v149_v26 = vld [vmem:[#allocation15 + $0x30] sm:$0xff] }
  0x25   :  { %232 = vst [vmem:[#allocation18 + $0x18] sm:$0xff] %v646_v1  ;;  %359 = vmatmul.msk.f32.vlgmr.msra.gmra.mxu0 %vm111_vm0, %v105_v11  ;;  %162 = vmatpush.msra.mxu1 %v155_v13  ;;  %v192_v23 = vld [vmem:[#allocation16 + $0x40] sm:$0xff]  ;;  %v150_v24 = vld [vmem:[#allocation15 + $0x38] sm:$0xff]  ;;  %v190_v27 = vld [vmem:[#allocation16 + $0x30] sm:$0xff] }
  0x26   :  { %203 = vmatpush.msra.mxu2 %v196_v14  ;;  %364 = vmatpush.msra.mxu3 %v155_v13  ;;  %v191_v25 = vld [vmem:[#allocation16 + $0x38] sm:$0xff]  ;;  %v148_v28 = vld [vmem:[#allocation15 + $0x28] sm:$0xff]  ;;  %v147_v30 = vld [vmem:[#allocation15 + $0x20] sm:$0xff] }
  0x27   :  { %163 = vmatpush.msra.mxu1 %v154_v15  ;;  %v189_v29 = vld [vmem:[#allocation16 + $0x28] sm:$0xff]  ;;  %v188_v31 = vld [vmem:[#allocation16 + $0x20] sm:$0xff]  ;;  %v146_v32 = vld [vmem:[#allocation15 + $0x18] sm:$0xff] }
  0x28   :  { %204 = vmatpush.msra.mxu2 %v195_v16  ;;  %365 = vmatpush.msra.mxu3 %v154_v15  ;;  %v187_v33 = vld [vmem:[#allocation16 + $0x18] sm:$0xff]  ;;  %v145_v34 = vld [vmem:[#allocation15 + $0x10] sm:$0xff]  ;;  %v144_v36 = vld [vmem:[#allocation15 + $0x8] sm:$0xff] }
  0x29   :  { %164 = vmatpush.msra.mxu1 %v153_v17  ;;  %v186_v35 = vld [vmem:[#allocation16 + $0x10] sm:$0xff]  ;;  %v185_v37 = vld [vmem:[#allocation16 + $0x8] sm:$0xff]  ;;  %v143_v38 = vld [vmem:[#allocation15] sm:$0xff] }
  0x2a   :  { %205 = vmatpush.msra.mxu2 %v194_v18  ;;  %366 = vmatpush.msra.mxu3 %v153_v17  ;;  %v184_v39 = vld [vmem:[#allocation16] sm:$0xff] }
  0x2b   :  { %165 = vmatpush.msra.mxu1 %v152_v19 }
  0x2c   :  { %206 = vmatpush.msra.mxu2 %v193_v21  ;;  %367 = vmatpush.msra.mxu3 %v152_v19 }
  0x2d   :  { %360 = vmatmul.msk.f32.gmra.mxu0 %vm111_vm0, %v106_v20  ;;  %166 = vmatpush.msra.mxu1 %v151_v22 }
  0x2e   :  { %207 = vmatpush.msra.mxu2 %v192_v23  ;;  %368 = vmatpush.msra.mxu3 %v151_v22 }
  0x2f   :  { %167 = vmatpush.msra.mxu1 %v150_v24 }
  0x30   :  { %208 = vmatpush.msra.mxu2 %v191_v25  ;;  %369 = vmatpush.msra.mxu3 %v150_v24 }
  0x31   :  { %168 = vmatpush.msra.mxu1 %v149_v26 }
  0x32   :  { %209 = vmatpush.msra.mxu2 %v190_v27  ;;  %370 = vmatpush.msra.mxu3 %v149_v26 }
  0x33   :  { %169 = vmatpush.msra.mxu1 %v148_v28 }
  0x34   :  { %210 = vmatpush.msra.mxu2 %v189_v29  ;;  %371 = vmatpush.msra.mxu3 %v148_v28 }
  0x35   :  { %170 = vmatpush.msra.mxu1 %v147_v30 }
  0x36   :  { %211 = vmatpush.msra.mxu2 %v188_v31  ;;  %372 = vmatpush.msra.mxu3 %v147_v30 }
  0x37   :  { %171 = vmatpush.msra.mxu1 %v146_v32 }
  0x38   :  { %212 = vmatpush.msra.mxu2 %v187_v33  ;;  %373 = vmatpush.msra.mxu3 %v146_v32 }
  0x39   :  { %172 = vmatpush.msra.mxu1 %v145_v34 }
  0x3a   :  { %213 = vmatpush.msra.mxu2 %v186_v35  ;;  %374 = vmatpush.msra.mxu3 %v145_v34 }
  0x3b   :  { %173 = vmatpush.msra.mxu1 %v144_v36 }
  0x3c   :  { %214 = vmatpush.msra.mxu2 %v185_v37  ;;  %375 = vmatpush.msra.mxu3 %v144_v36 }
  0x3d   :  { %174 = vmatpush.msra.mxu1 %v143_v38 }
  0x3e   :  { %215 = vmatpush.msra.mxu2 %v184_v39  ;;  %376 = vmatpush.msra.mxu3 %v143_v38 }
  0xa2   :  { %v135_v40 = vpop.f32.mrf.mxu0 }
  0xa3   :  { %141 = vst [vmem:[#allocation19] sm:$0xff] %v135_v40  ;;  %175 = vmatmul.f32.vlgmr.msra.gmra.mxu1 %v135_v40  ;;  %216 = vmatmul.f32.vlgmr.msra.gmra.mxu2 %v135_v40 }
  0xaa   :  { %v138_v41 = vpop.f32.mrf.mxu0 }
  0xab   :  { %142 = vst [vmem:[#allocation19 + $0x8] sm:$0xff] %v138_v41  ;;  %178 = vmatmul.f32.vlgmr.msra.gmra.mxu3 %v138_v41  ;;  %219 = vmatmul.f32.gmra.mxu2 %v138_v41 }
 0x120   :  { %v176_v42 = vpop.f32.mrf.mxu1 }
 0x121   :  { %182 = vst [vmem:[#allocation2] sm:$0xff] %v176_v42 }
 0x126   :  { %v217_v43 = vpop.f32.mrf.mxu2 }
 0x127   :  { %223 = vst [vmem:[#allocation3] sm:$0xff] %v217_v43 }
 0x12e   :  { %v179_v44 = vpop.f32.mrf.mxu3  ;;  %v220_v45 = vpop.f32.mrf.mxu2 }
 0x12f   :  { %183 = vst [vmem:[#allocation2 + $0x8] sm:$0xff] %v179_v44 }
 0x130   :  { %224 = vst [vmem:[#allocation3 + $0x8] sm:$0xff] %v220_v45 }
 0x131 LB: > { %s239_s11 = sld [smem:[#allocation7 + %s626_s6]]  ;;  %s250_s0 = scalar_lea.vmem [#allocation18], %s626_s6  ;;  %s626_s6 = sphi %s624_s6, %s238_s6  }
 0x132   : > { %s240_s12 = sld [smem:[#allocation8 + %s626_s6]] }
 0x133   : > { %s241_s13 = sld [smem:[#allocation9 + %s626_s6]]  ;;  %s238_s6 = sadd.s32 1, %s626_s6  }
 0x134   : > { %p235_p0 = scmp.ge.s32.totalorder %s238_s6, 32  }
 0x135   :  { %s628_s1 = smov (%p235_p0), 0  }
 0x137   : > { %s242_s14 = scalar_lea.vmem [#allocation2], %s239_s11 }
 0x138   : > { %v243_v46 = vld [vmem:[%s242_s14] sm:$0x1]  ;;  %s244_s15 = scalar_lea.vmem [#allocation3], %s240_s12 }
 0x139   : > { %v245_v47 = vld [vmem:[%s244_s15] sm:$0x1]  ;;  %s252_s16 = scalar_lea.vmem [#allocation4], %s241_s13 }
 0x13a   : > { %v246_v48 = vadd.f32 %v245_v47, %v243_v46  ;;  %v253_v50 = vld [vmem:[%s252_s16] sm:$0x1] }
 0x13c   : > { %vm247_vm1 = vcmp.gt.f32.partialorder %v246_v48, 0.0  ;;  %v248_v49 = vmul.f32 0.2, %v246_v48 }
 0x13d   :  { %237 = sbr.rel (!%p235_p0) target bundleno = 305 (0x131), region = 90 }
 0x13e   : > { %v249_v51 = vsel %vm247_vm1, %v246_v48, %v248_v49 }
 0x13f   : > { %251 = vst [vmem:[%s250_s0] sm:$0x1] %v249_v51  ;;  %v254_v52 = vmax.f32 %v253_v50, %v249_v51 }
 0x141   : > { %255 = vst [vmem:[%s252_s16] sm:$0x1] %v254_v52 }
 0x142 LB: > { %s262_s17 = sld [smem:[#allocation9 + %s630_s1]]  ;;  %s263_s18 = scalar_lea.vmem [#allocation18], %s630_s1  ;;  %s630_s1 = sphi %s628_s1, %s261_s1  }
 0x143   : > { %s261_s1 = sadd.s32 1, %s630_s1  }
 0x144   : > { %p258_p1 = scmp.ge.s32.totalorder %s261_s1, 32  }
 0x145   :  { %s632_s20 = smov (%p258_p1), 0  }
 0x146   : > { %v264_v53 = vld [vmem:[%s263_s18] sm:$0x1] }
 0x148   : > { %s265_s19 = scalar_lea.vmem [#allocation4], %s262_s17  ;;  %s271_s2 = scalar_lea.vmem [#allocation5], %s262_s17 }
 0x149   : > { %v266_v54 = vld [vmem:[%s265_s19] sm:$0x1] }
 0x14a   : > { %v267_v55 = vsub.f32 %v264_v53, %v266_v54  ;;  %v272_v57 = vld [vmem:[%s271_s2] sm:$0x1] }
 0x14c   : > { %v268_v56 = vmul.f32 1.442695, %v267_v55 }
 0x14e   : > { %414 = vpow2.f32 %v268_v56 }
 0x153   :  { %260 = sbr.rel (!%p258_p1) target bundleno = 322 (0x142), region = 101 }
 0x154   : > { %v415_v58 = vpop.eup %414 }
 0x155   : > { %270 = vst [vmem:[%s263_s18] sm:$0x1] %v415_v58  ;;  %v273_v59 = vadd.f32 %v415_v58, %v272_v57 }
 0x157   : > { %274 = vst [vmem:[%s271_s2] sm:$0x1] %v273_v59 }
 0x15e   :  { %v275_v60 = vld [vmem:[#allocation5] sm:$0xff]  ;;  %v276_v61 = vld [vmem:[#allocation5 + $0x8] sm:$0xff] }
 0x15f   :  { %v277_v62 = vadd.f32 1e-16, %v275_v60  ;;  %v278_v63 = vadd.f32 1e-16, %v276_v61 }
 0x161   :  { %416 = vrcp.f32 %v277_v62 }
 0x162   :  { %418 = vrcp.f32 %v278_v63 }
 0x167   :  { %v417_v0 = vpop.eup %416 }
 0x168   :  { %v419_v1 = vpop.eup %418  ;;  %281 = vst [vmem:[#allocation5] sm:$0xff] %v417_v0 }
 0x169   :  { %282 = vst [vmem:[#allocation5 + $0x8] sm:$0xff] %v419_v1 }
 0x16a LB: > { %s289_s21 = sld [smem:[#allocation9 + %s634_s20]]  ;;  %s290_s24 = scalar_lea.vmem [#allocation18], %s634_s20  ;;  %s634_s20 = sphi %s632_s20, %s288_s20  }
 0x16b   : > { %v291_v2 = vld [vmem:[%s290_s24] sm:$0x1]  ;;  %s288_s20 = sadd.s32 1, %s634_s20  }
 0x16c   : > { %p285_p2 = scmp.ge.s32.totalorder %s288_s20, 32  }
 0x16d   :  { %s302_s4 = sshll.u32 (%p285_p2), %s746_s7, 4  ;;  %s647_s3 = smov (%p285_p2), [#allocation18]   ;;  %s303_s4 = int_to_ptr.hbm [resolvable:$true] %s302_s4 }
 0x16e   :  { %s300_s28 = sshll.u32 (%p285_p2), %s647_s3, 4  ;;  %s648_s29 = smov (%p285_p2), [#allocation19]   ;;  %s301_s28 = int_to_ptr.vmem [resolvable:$true] %s300_s28 }
 0x16f   :  { %s313_s30 = sshll.u32 (%p285_p2), %s648_s29, 4  ;;  %s315_s5 = sshll.u32 (%p285_p2), %s747_s8, 4  ;;  %s314_s30 = int_to_ptr.vmem [resolvable:$true] %s313_s30  ;;  %s316_s5 = int_to_ptr.hbm [resolvable:$true] %s315_s5 }
 0x170   : > { %s292_s25 = scalar_lea.vmem [#allocation5], %s289_s21  ;;  %287 = sbr.rel (!%p285_p2) target bundleno = 362 (0x16a), region = 112 }
 0x171   : > { %v293_v3 = vld [vmem:[%s292_s25] sm:$0x1] }
 0x172   : > { %v294_v4 = vmul.f32 %v293_v3, %v291_v2  ;;  %321 = dma.vmem_to_hbm [thread:$0]  (%p285_p2), %s314_s30, 256, %s316_s5, [#allocation20], %s640_s22, %s640_s22, %s641_s23  }
 0x174   : > { %295 = vst [vmem:[%s290_s24] sm:$0x1] %v294_v4 }
 0x175   :  { %308 = dma.vmem_to_hbm [thread:$0]  %s301_s28, 512, %s303_s4, [#allocation12], %s640_s22, %s640_s22, %s641_s23  }
 0x176   :  { %620 = dma.done.wait [#allocation12], 512  }
 0x177   :  { %621 = vsyncadd [#allocation12], 4294966784 }
 0x178   :  { %622 = dma.done.wait [#allocation20], 256  }
 0x179   :  { %623 = vsyncadd [#allocation20], 4294967040 }
 0x17a   :  { %330 = vsyncpa [#allocation11], 1 }
 0x17b   :  { %331 = vsyncpa [#allocation14], 1 }
 0x17c   :  { %332 = vsyncpa [#allocation17], 1 }
 0x17d   :  { %333 = vsyncpa [#allocation12], 1 }
 0x17e   :  { %334 = vsyncpa [#allocation20], 1 }

</bundles_post_ra>
